<compile_context>
chip_gen: v7x
topology: tpu7x:2x2x1
jax: 0.10.0
libtpu: 0.0.40
codegen_flags: <defaults>
</compile_context>

<pallas_src>
import jax
import jax.numpy as jnp
from jax.experimental import pallas as pl
from jax.experimental.pallas import tpu as pltpu


# --------------------------------------------------------------------------- #
# Kernels
# --------------------------------------------------------------------------- #
def _sae_kernel_fused(x_ref, we_ref, be_ref, wd_ref, bd_ref, xrec_ref, z_ref):
    """Decoder accumulates directly into the (f32) resident x_rec output tile."""
    # x_ref:    (tb, d_model)       batch tile (compute dtype)
    # we_ref:   (d_model, th)       encoder weight tile (pre-transposed)
    # be_ref:   (1, d_hidden) f32   full encoder bias, resident in VMEM
    # wd_ref:   (th, d_model)       decoder weight tile (pre-transposed)
    # bd_ref:   (1, d_model) f32    decoder bias
    # xrec_ref: (tb, d_model) f32   output tile, resident across the hidden axis
    # z_ref:    (tb, th)            sparse-code output tile
    h = pl.program_id(1)
    th = we_ref.shape[1]

    @pl.when(h == 0)
    def _init():
        xrec_ref[...] = jnp.zeros_like(xrec_ref)

    if be_ref.shape[1] == th:               # static: single hidden tile
        be = be_ref[...]
    else:
        off = pl.multiple_of(h * th, th)
        be = be_ref[:, pl.ds(off, th)]

    # Encoder slice on the MXU (f32 accumulation), bias + ReLU on the VPU.
    pre = jnp.dot(x_ref[...], we_ref[...], preferred_element_type=jnp.float32)
    z = jnp.maximum(pre + be, 0.0)
    z_ref[...] = z.astype(z_ref.dtype)

    # Decoder partial product accumulated into the resident output (z stays in VMEM).
    xrec_ref[...] += jnp.dot(z.astype(wd_ref.dtype), wd_ref[...],
                             preferred_element_type=jnp.float32)

    @pl.when(h == pl.num_programs(1) - 1)
    def _finalize():
        xrec_ref[...] += bd_ref[...]


def _sae_kernel_scratch(x_ref, we_ref, be_ref, wd_ref, bd_ref, xrec_ref, z_ref,
                        acc_ref):
    """Variant with an explicit f32 accumulator (used when out dtype != f32)."""
    h = pl.program_id(1)
    th = we_ref.shape[1]

    @pl.when(h == 0)
    def _init():
        acc_ref[...] = jnp.zeros_like(acc_ref)

    if be_ref.shape[1] == th:
        be = be_ref[...]
    else:
        off = pl.multiple_of(h * th, th)
        be = be_ref[:, pl.ds(off, th)]

    pre = jnp.dot(x_ref[...], we_ref[...], preferred_element_type=jnp.float32)
    z = jnp.maximum(pre + be, 0.0)
    z_ref[...] = z.astype(z_ref.dtype)

    acc_ref[...] += jnp.dot(z.astype(wd_ref.dtype), wd_ref[...],
                            preferred_element_type=jnp.float32)

    @pl.when(h == pl.num_programs(1) - 1)
    def _finalize():
        xrec_ref[...] = (acc_ref[...] + bd_ref[...]).astype(xrec_ref.dtype)


# --------------------------------------------------------------------------- #
# Helpers
# --------------------------------------------------------------------------- #
def _round_up(n, m):
    return ((n + m - 1) // m) * m


def _pick_divisor_tile(total, desired, align):
    """Largest multiple of `align` that divides `total` and is <= desired;
    falls back to the full extent if none exists."""
    t = min(desired, total)
    t = (t // align) * align
    while t >= align:
        if total % t == 0:
            return t
        t -= align
    return total


def _vmem_capacity_bytes():
    try:
        return int(pltpu.get_tpu_info().vmem_capacity_bytes)
    except Exception:
        return 64 << 20   # conservative (v7x per-TensorCore)


def _fit_tiles(B, d_model, d_hidden, csize, osize, zsize, sub,
               vmem_budget, tb_req, th_req, use_scratch):
    """Clamp requested tiles to shapes, then shrink th (then tb) until the
    double-buffered working set fits the VMEM budget."""
    tb = min(tb_req, _round_up(B, sub))
    tb = max(sub, (tb // sub) * sub)
    th = _pick_divisor_tile(d_hidden, th_req, 128)

    def need(tb_, th_):
        n = 2 * (tb_ * d_model * csize        # x tile
                 + d_model * th_ * csize      # W_enc^T tile
                 + d_hidden * 4               # b_enc (resident, counted 2x to be safe)
                 + th_ * d_model * csize      # W_dec^T tile
                 + d_model * 4                # b_dec
                 + tb_ * d_model * osize      # x_rec out tile
                 + tb_ * th_ * zsize)         # z out tile
        if use_scratch:
            n += tb_ * d_model * 4            # f32 accumulator scratch
        return n

    while need(tb, th) > vmem_budget and th > 128:
        new_th = _pick_divisor_tile(d_hidden, th // 2, 128)
        if new_th >= th:
            break
        th = new_th
    while need(tb, th) > vmem_budget and tb > sub:
        tb = max(sub, (tb // 2 // sub) * sub)
    return tb, th, need(tb, th)


# --------------------------------------------------------------------------- #
# Public API
# --------------------------------------------------------------------------- #
def prepare_sae_params(w_enc, b_enc, w_dec, b_dec, *, compute_dtype=jnp.bfloat16):
    """One-time weight prep (transpose + cast) hoisted out of the forward hot path.

    Args (PyTorch nn.Linear layout):
      w_enc: (d_hidden, d_model), b_enc: (d_hidden,)
      w_dec: (d_model, d_hidden), b_dec: (d_model,)
    Returns (W_enc^T, b_enc[1,:], W_dec^T, b_dec[1,:]) in kernel-friendly layout.
    """
    compute_dtype = jnp.dtype(compute_dtype)
    we_t = jnp.asarray(w_enc).T.astype(compute_dtype)        # (d_model, d_hidden)
    wd_t = jnp.asarray(w_dec).T.astype(compute_dtype)        # (d_hidden, d_model)
    be2 = jnp.asarray(b_enc).reshape(1, -1).astype(jnp.float32)
    bd2 = jnp.asarray(b_dec).reshape(1, -1).astype(jnp.float32)
    return we_t, be2, wd_t, bd2


def sparse_autoencoder_forward_prepared(x, params, *, tb=None, th=512, z_dtype=None):
    """Fused SAE forward using pre-prepared (transposed / cast) parameters.

    Returns (x_reconstructed (B, d_model) in x.dtype, z (B, d_hidden) in z_dtype).
    """
    we_t, be2, wd_t, bd2 = params
    B, d_model = x.shape
    d_hidden = we_t.shape[1]
    assert we_t.shape == (d_model, d_hidden)
    assert wd_t.shape == (d_hidden, d_model)

    compute_dtype = jnp.dtype(we_t.dtype)
    out_dtype = jnp.dtype(x.dtype)
    z_dtype = jnp.dtype(z_dtype) if z_dtype is not None else out_dtype
    fuse_acc = (out_dtype == jnp.dtype(jnp.float32))   # accumulate directly in x_rec

    csize = compute_dtype.itemsize
    osize = out_dtype.itemsize
    zsize = z_dtype.itemsize
    sub = 16 if min(csize, osize, zsize) < 4 else 8     # sublane packing granularity

    # ----- generation-aware tile targets & VMEM budget ----------------------
    cap = _vmem_capacity_bytes()
    if tb is None:
        tb = 512 if cap >= (100 << 20) else 256          # v5e/v6e : v7x
    budget = int(cap * 0.85)

    tb_eff, th_eff, vmem_need = _fit_tiles(
        B, d_model, d_hidden, csize, osize, zsize, sub, budget, tb, th,
        use_scratch=not fuse_acc)

    Bp = _round_up(B, tb_eff)
    # Megacore: a single oversized batch tile would leave the second v7x
    # TensorCore idle on the "parallel" axis — split it if it stays MXU-sized.
    if Bp // tb_eff == 1 and tb_eff >= 512 and (tb_eff // 2) % sub == 0:
        tb_eff //= 2

    xc = x.astype(compute_dtype)
    if Bp != B:
        # TODO(synk): replace the pad with a pl.cdiv grid + masked partial last
        # batch tile to avoid the extra HBM pass on awkward batch remainders.
        xc = jnp.pad(xc, ((0, Bp - B), (0, 0)))

    grid = (Bp // tb_eff, d_hidden // th_eff)

    # ----- VMEM limit: working set + ~15% headroom, capped at 90% of capacity
    vmem_limit = int(vmem_need * 1.15) + (2 << 20)
    vmem_limit = max(vmem_limit, 16 << 20)
    vmem_limit = min(vmem_limit, int(cap * 0.9))

    # ----- advisory cost estimate -------------------------------------------
    n_batch_tiles = Bp // tb_eff
    flops = 4 * Bp * d_model * d_hidden                  # enc + dec matmuls
    bytes_accessed = (Bp * d_model * csize                                 # x
                      + n_batch_tiles * 2 * d_model * d_hidden * csize     # weights (streamed per batch tile)
                      + d_hidden * 4 + d_model * 4                         # biases
                      + Bp * d_model * osize + Bp * d_hidden * zsize)      # outputs
    cost = pl.CostEstimate(flops=flops, transcendentals=0,
                           bytes_accessed=bytes_accessed)

    out_shapes = (
        jax.ShapeDtypeStruct((Bp, d_model), out_dtype),   # x_reconstructed
        jax.ShapeDtypeStruct((Bp, d_hidden), z_dtype),    # z
    )

    kernel = _sae_kernel_fused if fuse_acc else _sae_kernel_scratch
    scratch_shapes = [] if fuse_acc else [pltpu.VMEM((tb_eff, d_model), jnp.float32)]

    f = pl.pallas_call(
        kernel,
        out_shape=out_shapes,
        grid_spec=pltpu.PrefetchScalarGridSpec(
            num_scalar_prefetch=0,
            grid=grid,
            in_specs=[
                pl.BlockSpec((tb_eff, d_model), lambda i, h: (i, 0)),   # x tile
                pl.BlockSpec((d_model, th_eff), lambda i, h: (0, h)),   # W_enc^T tile
                pl.BlockSpec((1, d_hidden),     lambda i, h: (0, 0)),   # b_enc (resident)
                pl.BlockSpec((th_eff, d_model), lambda i, h: (h, 0)),   # W_dec^T tile
                pl.BlockSpec((1, d_model),      lambda i, h: (0, 0)),   # b_dec
            ],
            out_specs=[
                pl.BlockSpec((tb_eff, d_model), lambda i, h: (i, 0)),   # x_rec (resident over h)
                pl.BlockSpec((tb_eff, th_eff),  lambda i, h: (i, h)),   # z
            ],
            scratch_shapes=scratch_shapes,
        ),
        compiler_params=pltpu.CompilerParams(
            dimension_semantics=("parallel", "arbitrary"),
            vmem_limit_bytes=vmem_limit,
        ),
        cost_estimate=cost,
    )
    x_rec, z = f(xc, we_t, be2, wd_t, bd2)
    if Bp != B:
        x_rec = x_rec[:B]
        z = z[:B]
    return x_rec, z


def sparse_autoencoder_forward(x, w_enc, b_enc, w_dec, b_dec, *,
                               compute_dtype=jnp.bfloat16, tb=None, th=512,
                               z_dtype=None):
    """Convenience wrapper (prepares weights per call).

    NOTE: for the hot path call prepare_sae_params() once and reuse it with
    sparse_autoencoder_forward_prepared() — the per-call transpose/cast is a
    full extra HBM pass over both weight matrices.
    """
    params = prepare_sae_params(w_enc, b_enc, w_dec, b_dec,
                                compute_dtype=compute_dtype)
    return sparse_autoencoder_forward_prepared(x, params, tb=tb, th=th,
                                               z_dtype=z_dtype)


def _reference(x, w_enc, b_enc, w_dec, b_dec):
    z = jnp.maximum(x @ w_enc.T + b_enc, 0.0)
    x_rec = z @ w_dec.T + b_dec
    return x_rec, z


# --------------------------------------------------------------------------- #
# Demo / correctness check
# --------------------------------------------------------------------------- #
if __name__ == "__main__":
    # Small shapes consistent with the module: batch=16, d_model=128, d_hidden=256.
    B, d_model, d_hidden = 16, 128, 256

    key = jax.random.PRNGKey(0)
    kx, k1, k2, k3, k4 = jax.random.split(key, 5)

    x = jax.random.normal(kx, (B, d_model), dtype=jnp.float32)

    # Deterministic init mimicking nn.Linear's uniform(-1/sqrt(fan_in), 1/sqrt(fan_in)).
    bound_e = 1.0 / (d_model ** 0.5)
    bound_d = 1.0 / (d_hidden ** 0.5)
    w_enc = jax.random.uniform(k1, (d_hidden, d_model), minval=-bound_e,
                               maxval=bound_e, dtype=jnp.float32)
    b_enc = jax.random.uniform(k2, (d_hidden,), minval=-bound_e,
                               maxval=bound_e, dtype=jnp.float32)
    w_dec = jax.random.uniform(k3, (d_model, d_hidden), minval=-bound_d,
                               maxval=bound_d, dtype=jnp.float32)
    b_dec = jax.random.uniform(k4, (d_model,), minval=-bound_d,
                               maxval=bound_d, dtype=jnp.float32)

    x_rec_expect, z_expect = _reference(x, w_enc, b_enc, w_dec, b_dec)

    # 1) f32 compute path — exact semantics of the PyTorch module.
    params_f32 = prepare_sae_params(w_enc, b_enc, w_dec, b_dec,
                                    compute_dtype=jnp.float32)
    x_rec, z = sparse_autoencoder_forward_prepared(x, params_f32)
    jax.block_until_ready((x_rec, z))
    assert x_rec.shape == (B, d_model) and z.shape == (B, d_hidden)
    assert jnp.allclose(x_rec, x_rec_expect, atol=1e-5, rtol=1e-5)
    assert jnp.allclose(z, z_expect, atol=1e-5, rtol=1e-5)

    # 2) f32 path with small tiles — exercises multi-tile batch axis, the
    #    hidden-axis accumulation and the resident-bias pl.ds slice.
    x_rec2, z2 = sparse_autoencoder_forward_prepared(x, params_f32, tb=8, th=128)
    jax.block_until_ready((x_rec2, z2))
    assert jnp.allclose(x_rec2, x_rec_expect, atol=1e-5, rtol=1e-5)
    assert jnp.allclose(z2, z_expect, atol=1e-5, rtol=1e-5)

    # 3) Default bf16-compute path (MXU-native, f32 accumulation) — loose check.
    x_rec_bf, z_bf = sparse_autoencoder_forward(x, w_enc, b_enc, w_dec, b_dec)
    jax.block_until_ready((x_rec_bf, z_bf))
    assert jnp.allclose(x_rec_bf, x_rec_expect, atol=1e-1, rtol=1e-1)
    assert jnp.allclose(z_bf, z_expect, atol=1e-1, rtol=1e-1)

    print("KERNEL_OK")
</pallas_src>

<mosaic_0001>
module attributes {stable_mosaic.version = 11 : i64} {
  func.func @_sae_kernel_fused(%arg0: i32, %arg1: i32, %arg2: memref<16x128xf32, #tpu.memory_space<vmem>>, %arg3: memref<128x256xf32, #tpu.memory_space<vmem>>, %arg4: memref<1x256xf32, #tpu.memory_space<vmem>>, %arg5: memref<256x128xf32, #tpu.memory_space<vmem>>, %arg6: memref<1x128xf32, #tpu.memory_space<vmem>>, %arg7: memref<16x128xf32, #tpu.memory_space<vmem>>, %arg8: memref<16x256xf32, #tpu.memory_space<vmem>>) attributes {dimension_semantics = [#tpu.dimension_semantics<parallel>, #tpu.dimension_semantics<arbitrary>], iteration_bounds = array<i64: 1, 1>, scalar_prefetch = 0 : i64, scratch_operands = 0 : i64, tpu.core_type = #tpu.core_type<tc>, window_params = [{transform_indices = @transform_0, window_bounds = array<i64: 16, 128>}, {transform_indices = @transform_1, window_bounds = array<i64: 128, 256>}, {pipeline_mode = #tpu.pipeline_mode<synchronous>, transform_indices = @transform_2, window_bounds = array<i64: 1, 256>}, {transform_indices = @transform_3, window_bounds = array<i64: 256, 128>}, {pipeline_mode = #tpu.pipeline_mode<synchronous>, transform_indices = @transform_4, window_bounds = array<i64: 1, 128>}, {transform_indices = @transform_5, window_bounds = array<i64: 16, 128>}, {transform_indices = @transform_6, window_bounds = array<i64: 16, 256>}]} {
    %c0_i32 = arith.constant 0 : i32
    %0 = arith.cmpi eq, %arg1, %c0_i32 : i32
    %1 = arith.extui %0 : i1 to i32
    %c0_i32_0 = arith.constant 0 : i32
    %2 = arith.cmpi ne, %1, %c0_i32_0 : i32
    scf.if %2 {
      %cst_18 = arith.constant 0.000000e+00 : f32
      %20 = vector.broadcast %cst_18 : f32 to vector<16x128xf32>
      %c0_19 = arith.constant 0 : index
      %c0_20 = arith.constant 0 : index
      %21 = vector.load %arg7[%c0_19, %c0_20] : memref<16x128xf32, #tpu.memory_space<vmem>>, vector<16x128xf32>
      tpu.vector_store %arg7[%c0_19, %c0_20], %20 {strides = array<i32>} : memref<16x128xf32, #tpu.memory_space<vmem>>, vector<16x128xf32>,
    } else {
    }
    %c0 = arith.constant 0 : index
    %c0_1 = arith.constant 0 : index
    %3 = vector.load %arg4[%c0, %c0_1] : memref<1x256xf32, #tpu.memory_space<vmem>>, vector<1x256xf32>
    %c0_2 = arith.constant 0 : index
    %c0_3 = arith.constant 0 : index
    %4 = vector.load %arg2[%c0_2, %c0_3] : memref<16x128xf32, #tpu.memory_space<vmem>>, vector<16x128xf32>
    %c0_4 = arith.constant 0 : index
    %c0_5 = arith.constant 0 : index
    %5 = vector.load %arg3[%c0_4, %c0_5] : memref<128x256xf32, #tpu.memory_space<vmem>>, vector<128x256xf32>
    %cst = arith.constant dense<0.000000e+00> : vector<16x256xf32>
    %6 = tpu.matmul %4, %5, %cst {dimension_numbers = #tpu.dot_dimension_numbers<[1], [0], [0], [1], [0, 0, 1, 1], [], []>} : vector<16x128xf32>, vector<128x256xf32>, vector<16x256xf32> -> vector<16x256xf32>
    %7 = vector.broadcast %3 : vector<1x256xf32> to vector<16x256xf32>
    %8 = arith.addf %6, %7 : vector<16x256xf32>
    %cst_6 = arith.constant 0.000000e+00 : f32
    %9 = vector.broadcast %cst_6 : f32 to vector<16x256xf32>
    %10 = arith.maximumf %8, %9 : vector<16x256xf32>
    %c0_7 = arith.constant 0 : index
    %c0_8 = arith.constant 0 : index
    %11 = vector.load %arg8[%c0_7, %c0_8] : memref<16x256xf32, #tpu.memory_space<vmem>>, vector<16x256xf32>
    tpu.vector_store %arg8[%c0_7, %c0_8], %10 {strides = array<i32>} : memref<16x256xf32, #tpu.memory_space<vmem>>, vector<16x256xf32>,
    %c0_9 = arith.constant 0 : index
    %c0_10 = arith.constant 0 : index
    %12 = vector.load %arg7[%c0_9, %c0_10] : memref<16x128xf32, #tpu.memory_space<vmem>>, vector<16x128xf32>
    %c0_11 = arith.constant 0 : index
    %c0_12 = arith.constant 0 : index
    %13 = vector.load %arg5[%c0_11, %c0_12] : memref<256x128xf32, #tpu.memory_space<vmem>>, vector<256x128xf32>
    %cst_13 = arith.constant dense<0.000000e+00> : vector<16x128xf32>
    %14 = tpu.matmul %10, %13, %cst_13 {dimension_numbers = #tpu.dot_dimension_numbers<[1], [0], [0], [1], [0, 0, 1, 1], [], []>} : vector<16x256xf32>, vector<256x128xf32>, vector<16x128xf32> -> vector<16x128xf32>
    %15 = arith.addf %12, %14 : vector<16x128xf32>
    %c0_14 = arith.constant 0 : index
    %c0_15 = arith.constant 0 : index
    %16 = vector.load %arg7[%c0_14, %c0_15] : memref<16x128xf32, #tpu.memory_space<vmem>>, vector<16x128xf32>
    tpu.vector_store %arg7[%c0_14, %c0_15], %15 {strides = array<i32>} : memref<16x128xf32, #tpu.memory_space<vmem>>, vector<16x128xf32>,
    %c0_i32_16 = arith.constant 0 : i32
    %17 = arith.cmpi eq, %arg1, %c0_i32_16 : i32
    %18 = arith.extui %17 : i1 to i32
    %c0_i32_17 = arith.constant 0 : i32
    %19 = arith.cmpi ne, %18, %c0_i32_17 : i32
    scf.if %19 {
      %c0_18 = arith.constant 0 : index
      %c0_19 = arith.constant 0 : index
      %20 = vector.load %arg7[%c0_18, %c0_19] : memref<16x128xf32, #tpu.memory_space<vmem>>, vector<16x128xf32>
      %c0_20 = arith.constant 0 : index
      %c0_21 = arith.constant 0 : index
      %21 = vector.load %arg6[%c0_20, %c0_21] : memref<1x128xf32, #tpu.memory_space<vmem>>, vector<1x128xf32>
      %22 = vector.broadcast %21 : vector<1x128xf32> to vector<16x128xf32>
      %23 = arith.addf %20, %22 : vector<16x128xf32>
      %c0_22 = arith.constant 0 : index
      %c0_23 = arith.constant 0 : index
      %24 = vector.load %arg7[%c0_22, %c0_23] : memref<16x128xf32, #tpu.memory_space<vmem>>, vector<16x128xf32>
      tpu.vector_store %arg7[%c0_22, %c0_23], %23 {strides = array<i32>} : memref<16x128xf32, #tpu.memory_space<vmem>>, vector<16x128xf32>,
    } else {
    }
    return
  }
  func.func @transform_0(%arg0: i32, %arg1: i32) -> (i32, i32) {
    %c0_i32 = arith.constant 0 : i32
    %c0_i32_0 = arith.constant 0 : i32
    return %arg0, %c0_i32 : i32, i32
  }
  func.func @transform_1(%arg0: i32, %arg1: i32) -> (i32, i32) {
    %c0_i32 = arith.constant 0 : i32
    %c0_i32_0 = arith.constant 0 : i32
    return %c0_i32, %arg1 : i32, i32
  }
  func.func @transform_2(%arg0: i32, %arg1: i32) -> (i32, i32) {
    %c0_i32 = arith.constant 0 : i32
    %c0_i32_0 = arith.constant 0 : i32
    %c0_i32_1 = arith.constant 0 : i32
    return %c0_i32, %c0_i32_0 : i32, i32
  }
  func.func @transform_3(%arg0: i32, %arg1: i32) -> (i32, i32) {
    %c0_i32 = arith.constant 0 : i32
    %c0_i32_0 = arith.constant 0 : i32
    return %arg1, %c0_i32 : i32, i32
  }
  func.func @transform_4(%arg0: i32, %arg1: i32) -> (i32, i32) {
    %c0_i32 = arith.constant 0 : i32
    %c0_i32_0 = arith.constant 0 : i32
    %c0_i32_1 = arith.constant 0 : i32
    return %c0_i32, %c0_i32_0 : i32, i32
  }
  func.func @transform_5(%arg0: i32, %arg1: i32) -> (i32, i32) {
    %c0_i32 = arith.constant 0 : i32
    %c0_i32_0 = arith.constant 0 : i32
    return %arg0, %c0_i32 : i32, i32
  }
  func.func @transform_6(%arg0: i32, %arg1: i32) -> (i32, i32) {
    %c0_i32 = arith.constant 0 : i32
    return %arg0, %arg1 : i32, i32
  }
}

</mosaic_0001>

<bundles_post_ra>
// kernel: tpu_custom_call.1
= control target key start
LH: loop header
LB: loop body
LE: loop exit
PB: predicated region body
PF: predicated region fallthrough
CT: control target
= control target key end

     0   :  { %12 = vsyncpa [#allocation3], 0  ;;  %s724_s0 = inlined_call_operand.hbm [shape: f32[16,128], index: 0, kind: input, shape index: {}]   ;;  %s725_s1 = inlined_call_operand.hbm [shape: f32[128,256], index: 1, kind: input, shape index: {}]   ;;  %s726_s2 = inlined_call_operand.vmem [shape: f32[1,256], index: 2, kind: input, shape index: {}]   ;;  %s727_s3 = inlined_call_operand.hbm [shape: f32[256,128], index: 3, kind: input, shape index: {}]   ;;  %s728_s4 = inlined_call_operand.vmem [shape: f32[1,128], index: 4, kind: input, shape index: {}]   ;;  %s729_s5 = inlined_call_operand.hbm [shape: f32[16,128], index: 5, kind: output, shape index: {0}]   ;;  %s730_s6 = inlined_call_operand.hbm [shape: f32[16,256], index: 6, kind: output, shape index: {1}]  }
   0x1   :  { %13 = vsyncpa [#allocation6], 0 }
   0x2   :  { %14 = vsyncpa [#allocation4], 0 }
   0x3   :  { %15 = vsyncpa [#allocation10], 0  ;;  %s596_s21 = smov [#allocation5]   ;;  %s478_s25 = scalar_lea.hbm %s725_s1, 4096 }
   0x4   :  { %s33_s22 = sshll.u32 %s596_s21, 4  ;;  %p479_p0 = scmp.ne.s32.totalorder %s725_s1, %s478_s25  ;;  %s34_s22 = int_to_ptr.vmem [resolvable:$true] %s33_s22 }
   0x5   :  { %p482_p1 = scmp.lt.u32.totalorder %s478_s25, %s725_s1 }
   0x7   :  { %p484_p2 = pnand %p482_p1, %p479_p0 }
   0x9   :  { %487 = shalt.err (!%p484_p2)
}
   0xa   :  { %s488_s30 = scalar_lea.vmem %s34_s22, 4096  ;;  %p493_p4 = scmp.lt.s32.totalorder %s34_s22, %s34_s22 }
   0xb   :  { %p489_p3 = scmp.ne.s32.totalorder %s34_s22, %s488_s30  ;;  %p494_p5 = scmp.lt.s32.totalorder %s488_s30, %s488_s30 }
   0xd   :  { %p495_p6 = por %p494_p5, %p493_p4 }
   0xf   :  { %p496_p7 = pnand %p495_p6, %p489_p3 }
  0x11   :  { %499 = shalt.err (!%p496_p7)
}
  0x12   :  { %s597_s7 = smov 256   ;;  %s598_s8 = smov 16  }
  0x13   :  { %39 = dma.hbm_to_vmem [thread:$0]  %s725_s1, 4096, %s34_s22, [#allocation6], %s597_s7, %s597_s7, %s598_s8  }
  0x14   :  { %s599_s11 = smov [#allocation2]   ;;  %s500_s15 = scalar_lea.hbm %s724_s0, 256 }
  0x15   :  { %s21_s12 = sshll.u32 %s599_s11, 4  ;;  %p501_p8 = scmp.ne.s32.totalorder %s724_s0, %s500_s15  ;;  %s22_s12 = int_to_ptr.vmem [resolvable:$true] %s21_s12 }
  0x16   :  { %p504_p9 = scmp.lt.u32.totalorder %s500_s15, %s724_s0 }
  0x18   :  { %p506_p10 = pnand %p504_p9, %p501_p8 }
  0x1a   :  { %509 = shalt.err (!%p506_p10)
}
  0x1b   :  { %s510_s20 = scalar_lea.vmem %s22_s12, 256  ;;  %p515_p12 = scmp.lt.s32.totalorder %s22_s12, %s22_s12 }
  0x1c   :  { %p511_p11 = scmp.ne.s32.totalorder %s22_s12, %s510_s20  ;;  %p516_p13 = scmp.lt.s32.totalorder %s510_s20, %s510_s20 }
  0x1e   :  { %p517_p0 = por %p516_p13, %p515_p12 }
  0x20   :  { %p518_p1 = pnand %p517_p0, %p511_p11 }
  0x22   :  { %521 = shalt.err (!%p518_p1)
}
  0x23   :  { %s600_s1 = smov 128   ;;  %s601_s21 = smov 8  }
  0x24   :  { %27 = dma.hbm_to_vmem [thread:$0]  %s724_s0, 256, %s22_s12, [#allocation3], %s600_s1, %s600_s1, %s601_s21  }
  0x25   :  { %s602_s24 = smov [#allocation7]   ;;  %s522_s28 = scalar_lea.hbm %s727_s3, 4096 }
  0x26   :  { %s47_s25 = sshll.u32 %s602_s24, 4  ;;  %p523_p2 = scmp.ne.s32.totalorder %s727_s3, %s522_s28  ;;  %s48_s25 = int_to_ptr.vmem [resolvable:$true] %s47_s25 }
  0x27   :  { %p526_p3 = scmp.lt.u32.totalorder %s522_s28, %s727_s3 }
  0x29   :  { %p528_p4 = pnand %p526_p3, %p523_p2 }
  0x2b   :  { %531 = shalt.err (!%p528_p4)
}
  0x2c   :  { %s532_s11 = scalar_lea.vmem %s48_s25, 4096  ;;  %p537_p6 = scmp.lt.s32.totalorder %s48_s25, %s48_s25 }
  0x2d   :  { %p533_p5 = scmp.ne.s32.totalorder %s48_s25, %s532_s11  ;;  %p538_p7 = scmp.lt.s32.totalorder %s532_s11, %s532_s11 }
  0x2f   :  { %p539_p8 = por %p538_p7, %p537_p6 }
  0x31   :  { %p540_p9 = pnand %p539_p8, %p533_p5 }
  0x33   :  { %543 = shalt.err (!%p540_p9)
}
  0x34   :  { %53 = dma.hbm_to_vmem [thread:$0]  %s727_s3, 4096, %s48_s25, [#allocation6], %s600_s1, %s600_s1, %s601_s21  }
  0x35   :  { %588 = dma.done.wait [#allocation3], 256  }
  0x36   :  { %589 = vsyncadd [#allocation3], 4294967040 }
  0x37   :  { %590 = dma.done.wait [#allocation6], 8192  }
  0x38   :  { %591 = vsyncadd [#allocation6], 4294959104  ;;  %v603_v0 = vmov 0.0   ;;  %v75_v1 = vld [vmem:[#allocation5 + $0x8] sm:$0xff]  ;;  %v77_v2 = vld [vmem:[#allocation5 + $0x18] sm:$0xff] }
  0x39   :  { %181 = vmatprep.mubr.f32.mxu0 %v603_v0  ;;  %v74_v3 = vld [vmem:[#allocation5] sm:$0xff]  ;;  %v404_v4 = vpack.c.bf16 %v77_v2, %v75_v1  ;;  %v76_v5 = vld [vmem:[#allocation5 + $0x10] sm:$0xff]  ;;  %v79_v6 = vld [vmem:[#allocation5 + $0x28] sm:$0xff] }
  0x3a   :  { %v81_v7 = vld [vmem:[#allocation5 + $0x38] sm:$0xff]  ;;  %v406_v8 = vpack.c.bf16 %v76_v5, %v74_v3  ;;  %v78_v10 = vld [vmem:[#allocation5 + $0x20] sm:$0xff]  ;;  %v80_v11 = vld [vmem:[#allocation5 + $0x30] sm:$0xff] }
  0x3b   :  { %v408_v9 = vpack.c.bf16 %v81_v7, %v79_v6  ;;  %v83_v12 = vld [vmem:[#allocation5 + $0x48] sm:$0xff]  ;;  %405 = vmatprep.subr.bf16.mxu0 %v404_v4  ;;  %v85_v13 = vld [vmem:[#allocation5 + $0x58] sm:$0xff]  ;;  %v410_v14 = vpack.c.bf16 %v80_v11, %v78_v10  ;;  %v82_v16 = vld [vmem:[#allocation5 + $0x40] sm:$0xff] }
  0x3c   :  { %407 = vmatpush1.bf16.msra.mxu0 %v406_v8  ;;  %v412_v15 = vpack.c.bf16 %v85_v13, %v83_v12  ;;  %v84_v17 = vld [vmem:[#allocation5 + $0x50] sm:$0xff]  ;;  %v87_v18 = vld [vmem:[#allocation5 + $0x68] sm:$0xff]  ;;  %v89_v19 = vld [vmem:[#allocation5 + $0x78] sm:$0xff] }
  0x3d   :  { %409 = vmatprep.subr.bf16.mxu0 %v408_v9  ;;  %v414_v20 = vpack.c.bf16 %v84_v17, %v82_v16  ;;  %v416_v21 = vpack.c.bf16 %v89_v19, %v87_v18  ;;  %v86_v22 = vld [vmem:[#allocation5 + $0x60] sm:$0xff]  ;;  %v88_v23 = vld [vmem:[#allocation5 + $0x70] sm:$0xff]  ;;  %v91_v24 = vld [vmem:[#allocation5 + $0x88] sm:$0xff] }
  0x3e   :  { %v93_v25 = vld [vmem:[#allocation5 + $0x98] sm:$0xff]  ;;  %v90_v26 = vld [vmem:[#allocation5 + $0x80] sm:$0xff]  ;;  %v92_v27 = vld [vmem:[#allocation5 + $0x90] sm:$0xff]  ;;  %v418_v30 = vpack.c.bf16 %v88_v23, %v86_v22 }
  0x3f   :  { %v220_v28 = vld [vmem:[#allocation7 + $0x80] sm:$0xff]  ;;  %v221_v29 = vld [vmem:[#allocation7 + $0x88] sm:$0xff]  ;;  %v222_v35 = vld [vmem:[#allocation7 + $0x90] sm:$0xff]  ;;  %v420_v36 = vpack.c.bf16 %v93_v25, %v91_v24  ;;  %v422_v46 = vpack.c.bf16 %v92_v27, %v90_v26 }
  0x40   :  { %411 = vmatpush1.bf16.msra.mxu0 %v410_v14  ;;  %v95_v31 = vld [vmem:[#allocation5 + $0xa8] sm:$0xff]  ;;  %v436_v32 = vpack.c.bf16 %v221_v29, %v220_v28  ;;  %v204_v33 = vld [vmem:[#allocation7] sm:$0xff]  ;;  %v223_v38 = vld [vmem:[#allocation7 + $0x98] sm:$0xff] }
  0x41   :  { %413 = vmatprep.subr.bf16.mxu0 %v412_v15  ;;  %v205_v34 = vld [vmem:[#allocation7 + $0x8] sm:$0xff]  ;;  %v206_v39 = vld [vmem:[#allocation7 + $0x10] sm:$0xff]  ;;  %v207_v40 = vld [vmem:[#allocation7 + $0x18] sm:$0xff]  ;;  %v440_v42 = vpack.c.bf16 %v223_v38, %v222_v35 }
  0x42   :  { %v438_v37 = vpack.c.bf16 %v205_v34, %v204_v33  ;;  %v97_v41 = vld [vmem:[#allocation5 + $0xb8] sm:$0xff]  ;;  %437 = vmatprep.subr.bf16.mxu1 %v436_v32  ;;  %v224_v43 = vld [vmem:[#allocation7 + $0xa0] sm:$0xff]  ;;  %v225_v44 = vld [vmem:[#allocation7 + $0xa8] sm:$0xff]  ;;  %v442_v45 = vpack.c.bf16 %v207_v40, %v206_v39 }
  0x43   :  { %v94_v47 = vld [vmem:[#allocation5 + $0xa0] sm:$0xff]  ;;  %v444_v48 = vpack.c.bf16 %v225_v44, %v224_v43  ;;  %v209_v50 = vld [vmem:[#allocation7 + $0x28] sm:$0xff]  ;;  %v424_v51 = vpack.c.bf16 %v97_v41, %v95_v31  ;;  %v96_v52 = vld [vmem:[#allocation5 + $0xb0] sm:$0xff] }
  0x44   :  { %415 = vmatpush1.bf16.msra.mxu0 %v414_v20  ;;  %439 = vmatpush3.bf16.msra.mxu1 %v438_v37  ;;  %v208_v49 = vld [vmem:[#allocation7 + $0x20] sm:$0xff]  ;;  %v226_v53 = vld [vmem:[#allocation7 + $0xb0] sm:$0xff]  ;;  %v227_v54 = vld [vmem:[#allocation7 + $0xb8] sm:$0xff]  ;;  %v426_v58 = vpack.c.bf16 %v96_v52, %v94_v47 }
  0x45   :  { %417 = vmatprep.subr.bf16.mxu0 %v416_v21  ;;  %441 = vmatprep.subr.bf16.mxu1 %v440_v42  ;;  %v99_v55 = vld [vmem:[#allocation5 + $0xc8] sm:$0xff]  ;;  %v101_v56 = vld [vmem:[#allocation5 + $0xd8] sm:$0xff]  ;;  %v446_v57 = vpack.c.bf16 %v209_v50, %v208_v49  ;;  %v98_v59 = vld [vmem:[#allocation5 + $0xc0] sm:$0xff]  ;;  %v448_v60 = vpack.c.bf16 %v227_v54, %v226_v53 }
  0x46   :  { %v210_v61 = vld [vmem:[#allocation7 + $0x30] sm:$0xff]  ;;  %v211_v62 = vld [vmem:[#allocation7 + $0x38] sm:$0xff]  ;;  %v428_v63 = vpack.c.bf16 %v101_v56, %v99_v55  ;;  %v228_v2 = vld [vmem:[#allocation7 + $0xc0] sm:$0xff] }
  0x47   :  { %v100_v1 = vld [vmem:[#allocation5 + $0xd0] sm:$0xff]  ;;  %v229_v3 = vld [vmem:[#allocation7 + $0xc8] sm:$0xff]  ;;  %v105_v5 = vld [vmem:[#allocation5 + $0xf8] sm:$0xff]  ;;  %v450_v6 = vpack.c.bf16 %v211_v62, %v210_v61 }
  0x48   :  { %419 = vmatpush1.bf16.msra.mxu0 %v418_v30  ;;  %443 = vmatpush3.bf16.msra.mxu1 %v442_v45  ;;  %v103_v4 = vld [vmem:[#allocation5 + $0xe8] sm:$0xff]  ;;  %v430_v7 = vpack.c.bf16 %v100_v1, %v98_v59  ;;  %v102_v8 = vld [vmem:[#allocation5 + $0xe0] sm:$0xff]  ;;  %v452_v9 = vpack.c.bf16 %v229_v3, %v228_v2  ;;  %v104_v13 = vld [vmem:[#allocation5 + $0xf0] sm:$0xff] }
  0x49   :  { %421 = vmatprep.subr.bf16.mxu0 %v420_v36  ;;  %445 = vmatprep.subr.bf16.mxu1 %v444_v48  ;;  %v212_v10 = vld [vmem:[#allocation7 + $0x40] sm:$0xff]  ;;  %v213_v11 = vld [vmem:[#allocation7 + $0x48] sm:$0xff]  ;;  %v432_v12 = vpack.c.bf16 %v105_v5, %v103_v4  ;;  %v230_v14 = vld [vmem:[#allocation7 + $0xd0] sm:$0xff]  ;;  %v434_v17 = vpack.c.bf16 %v104_v13, %v102_v8  ;;  %v107_v36 = vlaneseq }
  0x4a   :  { %v231_v15 = vld [vmem:[#allocation7 + $0xd8] sm:$0xff]  ;;  %v454_v16 = vpack.c.bf16 %v213_v11, %v212_v10  ;;  %v214_v19 = vld [vmem:[#allocation7 + $0x50] sm:$0xff]  ;;  %v232_v21 = vld [vmem:[#allocation7 + $0xe0] sm:$0xff] }
  0x4b   :  { %v456_v18 = vpack.c.bf16 %v231_v15, %v230_v14  ;;  %v215_v20 = vld [vmem:[#allocation7 + $0x58] sm:$0xff]  ;;  %v233_v22 = vld [vmem:[#allocation7 + $0xe8] sm:$0xff]  ;;  %v72_v24 = vld [vmem:[#allocation2] sm:$0xff]  ;;  %v108_v37 = vshrl.u32 %v107_v36, 7 }
  0x4c   :  { %423 = vmatpush1.bf16.msra.mxu0 %v422_v46  ;;  %447 = vmatpush3.bf16.msra.mxu1 %v446_v57  ;;  %v458_v23 = vpack.c.bf16 %v215_v20, %v214_v19  ;;  %v460_v25 = vpack.c.bf16 %v233_v22, %v232_v21  ;;  %v73_v26 = vld [vmem:[#allocation2 + $0x8] sm:$0xff]  ;;  %v216_v27 = vld [vmem:[#allocation7 + $0x60] sm:$0xff]  ;;  %v217_v28 = vld [vmem:[#allocation7 + $0x68] sm:$0xff] }
  0x4d   :  { %425 = vmatprep.subr.bf16.mxu0 %v424_v51  ;;  %449 = vmatprep.subr.bf16.mxu1 %v448_v60  ;;  %v462_v29 = vpack.c.bf16 %v217_v28, %v216_v27  ;;  %v234_v30 = vld [vmem:[#allocation7 + $0xf0] sm:$0xff]  ;;  %v235_v31 = vld [vmem:[#allocation7 + $0xf8] sm:$0xff]  ;;  %v109_v38 = vsub.s32 0, %v108_v37  ;;  %v113_v39 = vsub.s32 1, %v108_v37 }
  0x4e   :  { %v464_v32 = vpack.c.bf16 %v235_v31, %v234_v30  ;;  %v218_v33 = vld [vmem:[#allocation7 + $0x70] sm:$0xff]  ;;  %v219_v34 = vld [vmem:[#allocation7 + $0x78] sm:$0xff] }
  0x4f   :  { %v466_v35 = vpack.c.bf16 %v219_v34, %v218_v33 }
  0x50   :  { %427 = vmatpush1.bf16.msra.mxu0 %v426_v58  ;;  %451 = vmatpush3.bf16.msra.mxu1 %v450_v6 }
  0x51   :  { %429 = vmatprep.subr.bf16.mxu0 %v428_v63  ;;  %453 = vmatprep.subr.bf16.mxu1 %v452_v9 }
  0x54   :  { %431 = vmatpush1.bf16.msra.mxu0 %v430_v7  ;;  %455 = vmatpush3.bf16.msra.mxu1 %v454_v16 }
  0x55   :  { %433 = vmatprep.subr.bf16.mxu0 %v432_v12  ;;  %457 = vmatprep.subr.bf16.mxu1 %v456_v18 }
  0x58   :  { %435 = vmatpush1.bf16.msra.mxu0 %v434_v17  ;;  %459 = vmatpush3.bf16.msra.mxu1 %v458_v23 }
  0x59   :  { %461 = vmatprep.subr.bf16.mxu1 %v460_v25 }
  0x5b   :  { %182 = vmatmul.mubr.f32.vlgmr.msra.gmra.mrb[0].mxu0 %v72_v24 }
  0x5c   :  { %187 = vmatprep.mubr.f32.mxu0 %v603_v0  ;;  %463 = vmatpush3.bf16.msra.mxu1 %v462_v29  ;;  %v71_v0 = vld [vmem:[%s726_s2] sm:$0x3]  ;;  %s604_s2 = smov [#allocation9]  }
  0x5d   :  { %465 = vmatprep.subr.bf16.mxu1 %v464_v32  ;;  %v110_v40 = vrot.slane %v71_v0, %v109_v38  ;;  %v114_v41 = vrot.slane %v71_v0, %v113_v39  ;;  %s348_s14 = sshll.u32 %s604_s2, 4  ;;  %s349_s14 = int_to_ptr.vmem [resolvable:$true] %s348_s14 }
  0x5e   :  { %s544_s15 = scalar_lea.vmem %s349_s14, 512  ;;  %p549_p11 = scmp.lt.s32.totalorder %s349_s14, %s349_s14 }
  0x5f   :  { %188 = vmatmul.mubr.f32.gmra.mrb[2].mxu0 %v73_v26  ;;  %p545_p10 = scmp.ne.s32.totalorder %s349_s14, %s544_s15  ;;  %p550_p12 = scmp.lt.s32.totalorder %s544_s15, %s544_s15 }
  0x60   :  { %467 = vmatpush3.bf16.msra.mxu1 %v466_v35 }
  0x61   :  { %p551_p13 = por %p550_p12, %p549_p11 }
  0x63   :  { %p552_p0 = pnand %p551_p13, %p545_p10 }
 0x12e   :  { %v183_v42 = vpop.f32.mrb[0].mxu0 }
 0x12f   :  { %v184_v43 = vadd.f32 %v183_v42, %v110_v40  ;;  %v185_v44 = vpop.f32.mrb[1].mxu0 }
 0x130   :  { %v186_v45 = vadd.f32 %v185_v44, %v114_v41 }
 0x131   :  { %v194_v46 = vmax.f32 %v184_v43, 0.0 }
 0x132   :  { %v195_v47 = vmax.f32 %v186_v45, 0.0  ;;  %v189_v48 = vpop.f32.mrb[2].mxu0 }
 0x133   :  { %198 = vst [vmem:[#allocation9] sm:$0xff] %v194_v46  ;;  %v190_v49 = vadd.f32 %v189_v48, %v110_v40  ;;  %v191_v50 = vpop.f32.mrb[3].mxu0 }
 0x134   :  { %199 = vst [vmem:[#allocation9 + $0x8] sm:$0xff] %v195_v47  ;;  %v192_v51 = vadd.f32 %v191_v50, %v114_v41  ;;  %300 = vmatprep.mubr.f32.mxu1 %v195_v47 }
 0x135   :  { %v196_v52 = vmax.f32 %v190_v49, 0.0  ;;  %301 = vmatmul.mubr.f32.vlgmr.msra.gmra.mrb[0].mxu1 %v194_v46 }
 0x136   :  { %v197_v53 = vmax.f32 %v192_v51, 0.0 }
 0x137   :  { %200 = vst [vmem:[#allocation9 + $0x10] sm:$0xff] %v196_v52 }
 0x138   :  { %201 = vst [vmem:[#allocation9 + $0x18] sm:$0xff] %v197_v53  ;;  %305 = vmatprep.mubr.f32.mxu1 %v197_v53 }
 0x139   :  { %306 = vmatmul.mubr.f32.gmra.mrb[2].mxu1 %v196_v52 }
 0x13a   :  { %555 = shalt.err (!%p552_p0)
}
 0x13b   :  { %s556_s18 = scalar_lea.hbm %s730_s6, 512 }
 0x13c   :  { %p557_p1 = scmp.ne.s32.totalorder %s730_s6, %s556_s18  ;;  %p560_p2 = scmp.lt.u32.totalorder %s556_s18, %s730_s6 }
 0x13e   :  { %p562_p3 = pnand %p560_p2, %p557_p1 }
 0x140   :  { %565 = shalt.err (!%p562_p3)
}
 0x141   :  { %354 = dma.vmem_to_hbm [thread:$0]  %s349_s14, 512, %s730_s6, [#allocation10], %s597_s7, %s597_s7, %s598_s8  }
 0x142   :  { %v365_v57 = vld [vmem:[%s728_s4] ss:$0 sm:$0xff]  ;;  %s605_s28 = smov [#allocation8]  }
 0x143   :  { %s336_s29 = sshll.u32 %s605_s28, 4  ;;  %s337_s29 = int_to_ptr.vmem [resolvable:$true] %s336_s29 }
 0x144   :  { %s566_s30 = scalar_lea.vmem %s337_s29, 256  ;;  %p571_p5 = scmp.lt.s32.totalorder %s337_s29, %s337_s29 }
 0x145   :  { %p567_p4 = scmp.ne.s32.totalorder %s337_s29, %s566_s30  ;;  %p572_p6 = scmp.lt.s32.totalorder %s566_s30, %s566_s30 }
 0x147   :  { %p573_p7 = por %p572_p6, %p571_p5 }
 0x149   :  { %p574_p8 = pnand %p573_p7, %p567_p4 }
 0x208   :  { %v398_v54 = vpop.f32.mrb[0].mxu1 }
 0x209   :  { %v399_v55 = vpop.f32.mrb[1].mxu1 }
 0x20a   :  { %v400_v56 = vadd.f32 %v399_v55, %v398_v54 }
 0x20c   :  { %v401_v58 = vpop.f32.mrb[2].mxu1  ;;  %v327_v61 = vadd.f32 %v400_v56, %v365_v57 }
 0x20d   :  { %v402_v59 = vpop.f32.mrb[3].mxu1 }
 0x20e   :  { %v403_v60 = vadd.f32 %v402_v59, %v401_v58  ;;  %329 = vst [vmem:[#allocation8] sm:$0xff] %v327_v61 }
 0x210   :  { %v328_v62 = vadd.f32 %v403_v60, %v365_v57 }
 0x212   :  { %330 = vst [vmem:[#allocation8 + $0x8] sm:$0xff] %v328_v62 }
 0x213   :  { %577 = shalt.err (!%p574_p8)
}
 0x214   :  { %s578_s4 = scalar_lea.hbm %s729_s5, 256 }
 0x215   :  { %p579_p9 = scmp.ne.s32.totalorder %s729_s5, %s578_s4  ;;  %p582_p10 = scmp.lt.u32.totalorder %s578_s4, %s729_s5 }
 0x217   :  { %p584_p11 = pnand %p582_p10, %p579_p9 }
 0x219   :  { %587 = shalt.err (!%p584_p11)
}
 0x21a   :  { %342 = dma.vmem_to_hbm [thread:$0]  %s337_s29, 256, %s729_s5, [#allocation4], %s600_s1, %s600_s1, %s601_s21  }
 0x21b   :  { %592 = dma.done.wait [#allocation4], 256  }
 0x21c   :  { %593 = vsyncadd [#allocation4], 4294967040 }
 0x21d   :  { %594 = dma.done.wait [#allocation10], 512  }
 0x21e   :  { %595 = vsyncadd [#allocation10], 4294966784 }
 0x21f   :  { %361 = vsyncpa [#allocation3], 1 }
 0x220   :  { %362 = vsyncpa [#allocation6], 1 }
 0x221   :  { %363 = vsyncpa [#allocation4], 1 }
 0x222   :  { %364 = vsyncpa [#allocation10], 1 }

</bundles_post_ra>
